<compile_context>
chip_gen: v7x
topology: tpu7x:2x2x1
jax: 0.10.0
libtpu: 0.0.40
codegen_flags: <defaults>
</compile_context>

<pallas_src>
import functools

import jax
import jax.numpy as jnp
from jax.experimental import pallas as pl
from jax.experimental.pallas import tpu as pltpu


_VMEM_TILE_BUDGET = 8 << 20   # bytes for double-buffered f32 input tiles (all gens)


def _choose_block_k(n_rows, p):
    """Largest lane tile (multiple of 128) whose double-buffered f32 inputs fit
    the budget; falls back to the full P (block == full dim is always legal)."""
    per_lane_bytes = 2 * (n_rows + 1) * 4   # 2 buffers x (prob rows + dens row) x f32
    tk = (_VMEM_TILE_BUDGET // per_lane_bytes) // 128 * 128
    tk = max(128, tk)
    if tk >= p:
        return p
    return tk


def _compiler_params():
    return pltpu.CompilerParams(
        # Single grid axis is a reduction carrying the accumulator.
        dimension_semantics=("arbitrary",),
        # Above v5e's 16 MiB scoped default, below every generation's physical cap.
        vmem_limit_bytes=48 << 20,
    )


def _make_bay_kernel(n_rows, p_total, block_k, use_bg):
    need_mask = (p_total % block_k) != 0

    def kernel(prob_ref, dens_ref, out_ref, acc_ref):
        k = pl.program_id(0)

        @pl.when(k == 0)
        def _init():
            acc_ref[...] = jnp.zeros_like(acc_ref)

        # (n_rows, block_k) broadcast multiply on the VPU.
        prod = prob_ref[...] * dens_ref[...]
        if need_mask:
            lane = (jax.lax.broadcasted_iota(jnp.int32, prod.shape, 1)
                    + k * block_k)
            prod = jnp.where(lane < p_total, prod, 0.0)
        # Per-tile cross-lane reduce (XLU); hidden under the HBM DMA.
        acc_ref[...] += jnp.sum(prod, axis=1, keepdims=True)

        @pl.when(k == pl.num_programs(0) - 1)
        def _finalize():
            pre_count = acc_ref[...]                       # (n_rows, 1)
            if use_bg:
                # target = ones(N) with the last (background) row zeroed.
                row = jax.lax.broadcasted_iota(jnp.int32, (n_rows, 1), 0)
                target = jnp.where(row == n_rows - 1, 0.0, 1.0)
            else:
                target = jnp.ones((n_rows, 1), jnp.float32)
            out_ref[...] = jnp.sum(jnp.abs(target - pre_count)).reshape(1, 1)

    return kernel


@functools.partial(jax.jit, static_argnames=("use_bg", "block_k"))
def bay_sample_loss(prob, density_flat, use_bg, block_k=None):
    """sum_n |target[n] - sum_p prob[n, p] * density[p]| for one sample."""
    prob = prob.astype(jnp.float32)
    n, p = prob.shape
    dens = density_flat.astype(jnp.float32).reshape(1, p)

    tk = _choose_block_k(n, p) if block_k is None else int(block_k)
    assert tk == p or tk % 128 == 0, "block_k must be a 128-multiple or the full P"
    num_k = pl.cdiv(p, tk)

    out = pl.pallas_call(
        _make_bay_kernel(n, p, tk, bool(use_bg)),
        out_shape=jax.ShapeDtypeStruct((1, 1), jnp.float32),
        grid_spec=pltpu.PrefetchScalarGridSpec(
            num_scalar_prefetch=0,
            grid=(num_k,),
            in_specs=[
                pl.BlockSpec((n, tk), lambda k: (0, k)),   # prob tile
                pl.BlockSpec((1, tk), lambda k: (0, k)),   # density tile (bcast over N)
            ],
            out_specs=pl.BlockSpec((1, 1), lambda k: (0, 0)),
            scratch_shapes=[pltpu.VMEM((n, 1), jnp.float32)],
        ),
        compiler_params=_compiler_params(),
        cost_estimate=pl.CostEstimate(
            flops=2 * n * p,
            transcendentals=0,
            bytes_accessed=(n * p + p) * 4 + 4,
        ),
    )(prob, dens)
    return out[0, 0]


def _make_sum_kernel(p_total, block_k):
    need_mask = (p_total % block_k) != 0

    def kernel(dens_ref, out_ref, acc_ref):
        k = pl.program_id(0)

        @pl.when(k == 0)
        def _init():
            acc_ref[...] = jnp.zeros_like(acc_ref)

        v = dens_ref[...]                                  # (1, block_k)
        if need_mask:
            lane = (jax.lax.broadcasted_iota(jnp.int32, v.shape, 1)
                    + k * block_k)
            v = jnp.where(lane < p_total, v, 0.0)
        acc_ref[...] += jnp.sum(v, axis=1, keepdims=True)

        @pl.when(k == pl.num_programs(0) - 1)
        def _finalize():
            # target == 0 on the `prob is None` branch -> |0 - pre_count|.
            out_ref[...] = jnp.abs(acc_ref[...])

    return kernel


@functools.partial(jax.jit, static_argnames=("block_k",))
def density_abs_sum(density_flat, block_k=None):
    """|sum(density)| via a tiled sum-only kernel (the `prob is None` branch)."""
    dens = density_flat.astype(jnp.float32).reshape(1, -1)
    p = dens.shape[1]
    tk = _choose_block_k(1, p) if block_k is None else int(block_k)
    assert tk == p or tk % 128 == 0
    num_k = pl.cdiv(p, tk)

    out = pl.pallas_call(
        _make_sum_kernel(p, tk),
        out_shape=jax.ShapeDtypeStruct((1, 1), jnp.float32),
        grid_spec=pltpu.PrefetchScalarGridSpec(
            num_scalar_prefetch=0,
            grid=(num_k,),
            in_specs=[pl.BlockSpec((1, tk), lambda k: (0, k))],
            out_specs=pl.BlockSpec((1, 1), lambda k: (0, 0)),
            scratch_shapes=[pltpu.VMEM((1, 1), jnp.float32)],
        ),
        compiler_params=_compiler_params(),
        cost_estimate=pl.CostEstimate(
            flops=p, transcendentals=0, bytes_accessed=p * 4 + 4),
    )(dens)
    return out[0, 0]


class BayLoss:
    """JAX/Pallas port of Bay_Loss (forward only)."""

    def __init__(self, use_background):
        self.use_bg = bool(use_background)

    def __call__(self, prob_list, pre_density):
        # The reference `loss += ...` sits OUTSIDE its for-loop, so only the
        # LAST element of prob_list contributes; all earlier iterations are
        # dead work.  Launch the kernel exactly once on the last pair.
        num = len(prob_list)
        last = num - 1
        prob = prob_list[last]
        dens_flat = pre_density[last].reshape(-1)
        if prob is None:
            sample_loss = density_abs_sum(dens_flat)
        else:
            sample_loss = bay_sample_loss(prob, dens_flat, use_bg=self.use_bg)
        return sample_loss / num


def _reference_jnp(prob_list, pre_density, use_bg):
    """Pure-jnp re-implementation of the PyTorch forward (same bug-for-bug
    semantics: only the last iteration's target/pre_count survive)."""
    loss = 0.0
    for idx, prob in enumerate(prob_list):
        if prob is None:
            pre_count = jnp.sum(pre_density[idx]).reshape(1)
            target = jnp.zeros((1,), jnp.float32)
        else:
            n = prob.shape[0]
            target = jnp.ones((n,), jnp.float32)
            if use_bg:
                target = target.at[-1].set(0.0)
            pre_count = jnp.sum(pre_density[idx].reshape(1, -1) * prob, axis=1)
    loss = loss + jnp.sum(jnp.abs(target - pre_count))
    return loss / len(prob_list)


if __name__ == "__main__":
    key = jax.random.PRNGKey(0)
    k1, k2, k3, k4, k5 = jax.random.split(key, 5)

    B, C, H, W = 2, 1, 16, 16      # NCHW density maps
    N = 8                          # annotated points (+ background row)
    P = H * W

    pre_density = jax.random.uniform(k1, (B, C, H, W), jnp.float32)
    prob0 = jax.nn.softmax(jax.random.normal(k2, (N, P), jnp.float32), axis=1)
    prob1 = jax.nn.softmax(jax.random.normal(k3, (N, P), jnp.float32), axis=1)
    prob_list = [prob0, prob1]

    # 1) default path (use_background=True)
    loss_fn = BayLoss(use_background=True)
    loss = jax.block_until_ready(loss_fn(prob_list, pre_density))
    ref = _reference_jnp(prob_list, pre_density, use_bg=True)
    assert jnp.allclose(loss, ref, rtol=1e-5, atol=1e-5), (loss, ref)

    # 2) no-background target
    loss_nb = jax.block_until_ready(BayLoss(False)(prob_list, pre_density))
    ref_nb = _reference_jnp(prob_list, pre_density, use_bg=False)
    assert jnp.allclose(loss_nb, ref_nb, rtol=1e-5, atol=1e-5), (loss_nb, ref_nb)

    # 3) `prob is None` branch (density-sum-only kernel)
    loss_none = jax.block_until_ready(loss_fn([prob0, None], pre_density))
    ref_none = _reference_jnp([prob0, None], pre_density, use_bg=True)
    assert jnp.allclose(loss_none, ref_none, rtol=1e-5, atol=1e-5), (loss_none, ref_none)

    # 4) force a multi-step reduction grid (block_k=128 -> grid=(2,)) to
    #    exercise the pl.when init / finalize accumulator path.
    tiled = jax.block_until_ready(
        bay_sample_loss(prob1, pre_density[1].reshape(-1), use_bg=True, block_k=128))
    tgt = jnp.ones((N,), jnp.float32).at[-1].set(0.0)
    pc = jnp.sum(pre_density[1].reshape(1, -1) * prob1, axis=1)
    ref_tiled = jnp.sum(jnp.abs(tgt - pc))
    assert jnp.allclose(tiled, ref_tiled, rtol=1e-5, atol=1e-5), (tiled, ref_tiled)

    # 5) ragged P (not a multiple of the lane tile) to exercise the in-kernel
    #    tail mask: P = 10*13 = 130, block_k=128 -> grid=(2,), tail of 2 lanes.
    Hr, Wr, Nr = 10, 13, 5
    dens_r = jax.random.uniform(k4, (Hr * Wr,), jnp.float32)
    prob_r = jax.nn.softmax(jax.random.normal(k5, (Nr, Hr * Wr), jnp.float32), axis=1)
    ragged = jax.block_until_ready(
        bay_sample_loss(prob_r, dens_r, use_bg=True, block_k=128))
    tgt_r = jnp.ones((Nr,), jnp.float32).at[-1].set(0.0)
    pc_r = jnp.sum(dens_r.reshape(1, -1) * prob_r, axis=1)
    ref_r = jnp.sum(jnp.abs(tgt_r - pc_r))
    assert jnp.allclose(ragged, ref_r, rtol=1e-5, atol=1e-5), (ragged, ref_r)

    print("KERNEL_OK")
</pallas_src>

<mosaic_0001>
module attributes {stable_mosaic.version = 11 : i64} {
  func.func @kernel(%arg0: i32, %arg1: memref<8x256xf32, #tpu.memory_space<vmem>>, %arg2: memref<1x256xf32, #tpu.memory_space<vmem>>, %arg3: memref<1x1xf32, #tpu.memory_space<vmem>>, %arg4: memref<8x1xf32, #tpu.memory_space<vmem>>) attributes {dimension_semantics = [#tpu.dimension_semantics<arbitrary>], iteration_bounds = array<i64: 1>, scalar_prefetch = 0 : i64, scratch_operands = 1 : i64, tpu.core_type = #tpu.core_type<tc>, window_params = [{transform_indices = @transform_0, window_bounds = array<i64: 8, 256>}, {transform_indices = @transform_1, window_bounds = array<i64: 1, 256>}, {pipeline_mode = #tpu.pipeline_mode<synchronous>, transform_indices = @transform_2, window_bounds = array<i64: 1, 1>}]} {
    %c0_i32 = arith.constant 0 : i32
    %0 = arith.cmpi eq, %arg0, %c0_i32 : i32
    %1 = arith.extui %0 : i1 to i32
    %c0_i32_0 = arith.constant 0 : i32
    %2 = arith.cmpi ne, %1, %c0_i32_0 : i32
    scf.if %2 {
      %cst_10 = arith.constant 0.000000e+00 : f32
      %15 = vector.broadcast %cst_10 : f32 to vector<8x1xf32>
      %c0_11 = arith.constant 0 : index
      %c0_12 = arith.constant 0 : index
      %16 = vector.load %arg4[%c0_11, %c0_12] : memref<8x1xf32, #tpu.memory_space<vmem>>, vector<8x1xf32>
      tpu.vector_store %arg4[%c0_11, %c0_12], %15 {strides = array<i32>} : memref<8x1xf32, #tpu.memory_space<vmem>>, vector<8x1xf32>,
    } else {
    }
    %c0 = arith.constant 0 : index
    %c0_1 = arith.constant 0 : index
    %3 = vector.load %arg1[%c0, %c0_1] : memref<8x256xf32, #tpu.memory_space<vmem>>, vector<8x256xf32>
    %c0_2 = arith.constant 0 : index
    %c0_3 = arith.constant 0 : index
    %4 = vector.load %arg2[%c0_2, %c0_3] : memref<1x256xf32, #tpu.memory_space<vmem>>, vector<1x256xf32>
    %5 = vector.broadcast %4 : vector<1x256xf32> to vector<8x256xf32>
    %6 = arith.mulf %3, %5 : vector<8x256xf32>
    %c0_4 = arith.constant 0 : index
    %c0_5 = arith.constant 0 : index
    %7 = vector.load %arg4[%c0_4, %c0_5] : memref<8x1xf32, #tpu.memory_space<vmem>>, vector<8x1xf32>
    %cst = arith.constant dense<0.000000e+00> : vector<8xf32>
    %8 = vector.multi_reduction <add>, %6, %cst [1] : vector<8x256xf32> to vector<8xf32>
    %9 = vector.shape_cast %8 : vector<8xf32> to vector<8x1xf32>
    %10 = arith.addf %7, %9 : vector<8x1xf32>
    %c0_6 = arith.constant 0 : index
    %c0_7 = arith.constant 0 : index
    %11 = vector.load %arg4[%c0_6, %c0_7] : memref<8x1xf32, #tpu.memory_space<vmem>>, vector<8x1xf32>
    tpu.vector_store %arg4[%c0_6, %c0_7], %10 {strides = array<i32>} : memref<8x1xf32, #tpu.memory_space<vmem>>, vector<8x1xf32>,
    %c0_i32_8 = arith.constant 0 : i32
    %12 = arith.cmpi eq, %arg0, %c0_i32_8 : i32
    %13 = arith.extui %12 : i1 to i32
    %c0_i32_9 = arith.constant 0 : i32
    %14 = arith.cmpi ne, %13, %c0_i32_9 : i32
    scf.if %14 {
      %c0_10 = arith.constant 0 : index
      %c0_11 = arith.constant 0 : index
      %15 = vector.load %arg4[%c0_10, %c0_11] : memref<8x1xf32, #tpu.memory_space<vmem>>, vector<8x1xf32>
      %16 = tpu.iota {dimensions = array<i32: 0>} : vector<8x1xi32>
      %c7_i32 = arith.constant 7 : i32
      %17 = vector.broadcast %c7_i32 : i32 to vector<8x1xi32>
      %18 = arith.cmpi eq, %16, %17 : vector<8x1xi32>
      %cst_12 = arith.constant 0.000000e+00 : f32
      %cst_13 = arith.constant 1.000000e+00 : f32
      %19 = vector.broadcast %cst_12 : f32 to vector<8x1xf32>
      %20 = vector.broadcast %cst_13 : f32 to vector<8x1xf32>
      %21 = arith.select %18, %19, %20 : vector<8x1xi1>, vector<8x1xf32>
      %22 = arith.subf %21, %15 : vector<8x1xf32>
      %23 = math.absf %22 : vector<8x1xf32>
      %24 = vector.shape_cast %23 : vector<8x1xf32> to vector<1x8x1xf32>
      %cst_14 = arith.constant dense<0.000000e+00> : vector<1xf32>
      %25 = vector.multi_reduction <add>, %24, %cst_14 [1, 2] : vector<1x8x1xf32> to vector<1xf32>
      %26 = vector.shape_cast %25 : vector<1xf32> to vector<1x1x1xf32>
      %27 = vector.extract %26[0, 0, 0] : f32 from vector<1x1x1xf32>
      %28 = vector.broadcast %27 : f32 to vector<1x1xf32>
      %c0_15 = arith.constant 0 : index
      %c0_16 = arith.constant 0 : index
      %29 = vector.load %arg3[%c0_15, %c0_16] : memref<1x1xf32, #tpu.memory_space<vmem>>, vector<1x1xf32>
      tpu.vector_store %arg3[%c0_15, %c0_16], %28 {strides = array<i32>} : memref<1x1xf32, #tpu.memory_space<vmem>>, vector<1x1xf32>,
    } else {
    }
    return
  }
  func.func @transform_0(%arg0: i32) -> (i32, i32) {
    %c0_i32 = arith.constant 0 : i32
    %c0_i32_0 = arith.constant 0 : i32
    return %c0_i32, %arg0 : i32, i32
  }
  func.func @transform_1(%arg0: i32) -> (i32, i32) {
    %c0_i32 = arith.constant 0 : i32
    %c0_i32_0 = arith.constant 0 : i32
    return %c0_i32, %arg0 : i32, i32
  }
  func.func @transform_2(%arg0: i32) -> (i32, i32) {
    %c0_i32 = arith.constant 0 : i32
    %c0_i32_0 = arith.constant 0 : i32
    %c0_i32_1 = arith.constant 0 : i32
    return %c0_i32, %c0_i32_0 : i32, i32
  }
}

</mosaic_0001>

<bundles_post_ra>
// kernel: bay_sample_loss.1
= control target key start
LH: loop header
LB: loop body
LE: loop exit
PB: predicated region body
PF: predicated region fallthrough
CT: control target
= control target key end

     0   :  { %7 = vsyncpa [#allocation4], 0  ;;  %s194_s0 = inlined_call_operand.hbm [shape: f32[8,256], index: 0, kind: input, shape index: {}]   ;;  %s195_s1 = inlined_call_operand.vmem [shape: f32[1,256], index: 1, kind: input, shape index: {}]   ;;  %s196_s2 = inlined_call_operand.hbm [shape: f32[1,1], index: 2, kind: output, shape index: {}]  }
   0x1   :  { %8 = vsyncpa [#allocation5], 0  ;;  %s145_s9 = smov [#allocation3]   ;;  %s97_s13 = scalar_lea.hbm %s194_s0, 256 }
   0x2   :  { %s15_s10 = sshll.u32 %s145_s9, 4  ;;  %p98_p0 = scmp.ne.s32.totalorder %s194_s0, %s97_s13  ;;  %s16_s10 = int_to_ptr.vmem [resolvable:$true] %s15_s10 }
   0x3   :  { %p101_p1 = scmp.lt.u32.totalorder %s97_s13, %s194_s0 }
   0x5   :  { %p103_p2 = pnand %p101_p1, %p98_p0 }
   0x7   :  { %106 = shalt.err (!%p103_p2)
}
   0x8   :  { %s107_s18 = scalar_lea.vmem %s16_s10, 256  ;;  %p112_p4 = scmp.lt.s32.totalorder %s16_s10, %s16_s10 }
   0x9   :  { %p108_p3 = scmp.ne.s32.totalorder %s16_s10, %s107_s18  ;;  %p113_p5 = scmp.lt.s32.totalorder %s107_s18, %s107_s18 }
   0xb   :  { %p114_p6 = por %p113_p5, %p112_p4 }
   0xd   :  { %p115_p7 = pnand %p114_p6, %p108_p3 }
   0xf   :  { %118 = shalt.err (!%p115_p7)
}
  0x10   :  { %18 = dma.hbm_to_vmem [thread:$0]  %s194_s0, 256, %s16_s10, [#allocation4]  }
  0x11   :  { %141 = dma.done.wait [#allocation4], 256  }
  0x12   :  { %142 = vsyncadd [#allocation4], 4294967040  ;;  %v34_v0 = vlaneseq  ;;  %vm28_vm0 = vcmask 7168   ;;  %v146_v1 = vmov 0.0   ;;  %v30_v5 = vld [vmem:[#allocation3] sm:$0xff]  ;;  %v31_v6 = vld [vmem:[#allocation3 + $0x8] sm:$0xff] }
  0x13   :  { %29 = vst.msk [vmem:[#allocation2] sm:$0xff] %vm28_vm0, %v146_v1  ;;  %v32_v7 = vld [vmem:[%s195_s1] sm:$0x3]  ;;  %v147_v16 = vmov 1.0   ;;  %s148_s0 = smov [#allocation6]   ;;  %vm74_vm2 = vcmask 0  }
  0x14   :  { %v35_v2 = vshrl.u32 %v34_v0, 7  ;;  %s82_s1 = sshll.u32 %s148_s0, 4  ;;  %s83_s1 = int_to_ptr.vmem [resolvable:$true] %s82_s1 }
  0x15   :  { %s119_s24 = scalar_lea.vmem %s83_s1, 16  ;;  %s123_s25 = scalar_lea.vmem %s83_s1, 32 }
  0x16   :  { %v36_v3 = vsub.s32 0, %v35_v2  ;;  %v40_v4 = vsub.s32 1, %v35_v2  ;;  %vm59_vm1 = vcmp.eq.s32.totalorder %v35_v2, 7  ;;  %p120_p8 = scmp.ne.s32.totalorder %s83_s1, %s119_s24  ;;  %p124_p9 = scmp.lt.s32.totalorder %s83_s1, %s83_s1 }
  0x17   :  { %v60_v17 = vsel %vm59_vm1, 0.0, %v147_v16  ;;  %p125_p10 = scmp.lt.s32.totalorder %s123_s25, %s119_s24 }
  0x18   :  { %v37_v8 = vrot.slane %v32_v7, %v36_v3  ;;  %v41_v9 = vrot.slane %v32_v7, %v40_v4 }
  0x19   :  { %p126_p11 = por %p125_p10, %p124_p9 }
  0x1a   :  { %v44_v10 = vmul.f32 %v37_v8, %v30_v5  ;;  %v45_v11 = vmul.f32 %v41_v9, %v31_v6  ;;  %v46_v13 = vld [vmem:[#allocation2] sm:$0xff] }
  0x1b   :  { %p127_p12 = pnand %p126_p11, %p120_p8 }
  0x1c   :  { %v47_v12 = vadd.f32 %v45_v11, %v44_v10 }
  0x1e   :  { %48 = vadd.xlane.f32.xlu0 %v47_v12 }
  0xab   :  { %v49_v14 = vpop.xlane.xlu0 %48 }
  0xac   :  { %v50_v15 = vadd.f32 %v49_v14, %v46_v13 }
  0xae   :  { %52 = vst.msk [vmem:[#allocation2] sm:$0xff] %vm28_vm0, %v50_v15 }
  0xb5   :  { %v56_v18 = vld [vmem:[#allocation2] sm:$0xff] }
  0xb6   :  { %v61_v19 = vsub.f32 %v60_v17, %v56_v18 }
  0xb8   :  { %v62_v20 = vand.u32 2147483647, %v61_v19 }
  0xba   :  { %v63_v21 = vsel %vm28_vm0, %v62_v20, 0.0 }
  0xbb   :  { %64 = vadd.xlane.f32.xlu0 %v63_v21 }
 0x148   :  { %v65_v22 = vpop.xlane.xlu0 %64 }
 0x149   :  { %v66_v23 = vrot.slane %v65_v22, 4 }
 0x14b   :  { %v67_v24 = vadd.f32 %v66_v23, %v65_v22 }
 0x14d   :  { %v68_v25 = vrot.slane %v67_v24, 2 }
 0x14f   :  { %v69_v26 = vadd.f32 %v68_v25, %v67_v24 }
 0x151   :  { %v70_v27 = vrot.slane %v69_v26, 1 }
 0x153   :  { %v71_v28 = vadd.f32 %v70_v27, %v69_v26 }
 0x155   :  { %91 = vpush %v71_v28 }
 0x186   :  { %s92_s23 = spop %91 }
 0x187   :  { %v73_v29 = vstv %s92_s23 }
 0x188   :  { %75 = vst.msk [vmem:[#allocation6] sm:$0x1] %vm74_vm2, %v73_v29 }
 0x189   :  { %130 = shalt.err (!%p127_p12)
}
 0x18a   :  { %s131_s28 = scalar_lea.hbm %s196_s2, 16 }
 0x18b   :  { %p132_p13 = scmp.ne.s32.totalorder %s196_s2, %s131_s28  ;;  %p135_p0 = scmp.lt.u32.totalorder %s131_s28, %s196_s2 }
 0x18d   :  { %p137_p1 = pnand %p135_p0, %p132_p13 }
 0x18f   :  { %140 = shalt.err (!%p137_p1)
}
 0x190   :  { %85 = dma.vmem_to_hbm [thread:$0]  %s83_s1, 16, %s196_s2, [#allocation5]  }
 0x191   :  { %143 = dma.done.wait [#allocation5], 16  }
 0x192   :  { %144 = vsyncadd [#allocation5], 4294967280 }
 0x193   :  { %89 = vsyncpa [#allocation4], 1 }
 0x194   :  { %90 = vsyncpa [#allocation5], 1 }

</bundles_post_ra>
